<compile_context>
chip_gen: v7x
topology: tpu7x:2x2x1
jax: 0.10.0
libtpu: 0.0.40
codegen_flags: <defaults>
</compile_context>

<pallas_src>
import functools
import math

import jax
import jax.numpy as jnp
from jax.experimental import pallas as pl
from jax.experimental.pallas import tpu as pltpu


def _round_up(x: int, m: int) -> int:
    return ((x + m - 1) // m) * m


def _gaussian_smearing_kernel(dist_ref, out_ref, *, scale, off0, doff):
    # dist_ref: (TN, 1) tile of flattened distances
    # out_ref:  (TN, G)
    g = out_ref.shape[-1]
    d = dist_ref[...] * scale                                   # (TN, 1)
    idx = jax.lax.broadcasted_iota(jnp.int32, (1, g), 1).astype(jnp.float32)
    off = off0 + doff * idx                                     # (1, G), pre-scaled
    t = d - off                                                 # (TN, G)
    # exp(coeff * (d - off)^2) == exp(-(sqrt(-coeff)*(d - off))^2)
    out_ref[...] = jnp.exp(-(t * t)).astype(out_ref.dtype)


class GaussianSmearing:
    """JAX/Pallas port of the PyTorch GaussianSmearing module."""

    def __init__(self, start: float, stop: float, num_gaussians: int,
                 basis_width_scalar: float) -> None:
        assert num_gaussians >= 2, "num_gaussians must be >= 2"
        self.num_output = num_gaussians
        self.offset = jnp.linspace(start, stop, num_gaussians, dtype=jnp.float32)
        step = (float(stop) - float(start)) / (num_gaussians - 1)
        self.coeff = -0.5 / (basis_width_scalar * step) ** 2
        # Pre-scaled constants: exp(coeff*(d-off)^2) = exp(-((s*d) - (s*off))^2)
        self._scale = math.sqrt(-self.coeff)
        self._off0 = self._scale * float(start)
        self._doff = self._scale * step

    def __call__(self, dist: jax.Array, *, block_n: int = 4096,
                 out_dtype=jnp.float32) -> jax.Array:
        g = self.num_output
        dist_flat = dist.reshape(-1).astype(jnp.float32)
        n = dist_flat.shape[0]

        # Tile: big for throughput, clamped (to a multiple of 8) for small N so
        # small inputs need neither padding nor a trailing slice.
        bn = max(8, min(block_n, _round_up(n, 8)))
        bn = _round_up(bn, 8)
        n_pad = _round_up(n, bn)
        if n_pad != n:
            dist_flat = jnp.pad(dist_flat, (0, n_pad - n))
        dist_col = dist_flat.reshape(n_pad, 1)

        out = pl.pallas_call(
            functools.partial(
                _gaussian_smearing_kernel,
                scale=self._scale, off0=self._off0, doff=self._doff),
            out_shape=jax.ShapeDtypeStruct((n_pad, g), out_dtype),
            grid_spec=pltpu.PrefetchScalarGridSpec(
                num_scalar_prefetch=0,
                grid=(n_pad // bn,),
                in_specs=[pl.BlockSpec((bn, 1), lambda i: (i, 0))],
                out_specs=pl.BlockSpec((bn, g), lambda i: (i, 0)),
            ),
            compiler_params=pltpu.CompilerParams(
                dimension_semantics=("parallel",),
            ),
        )(dist_col)

        if n_pad != n:
            # Only pay for the slice when padding actually happened.
            out = out[:n]
        return out


def _reference(dist, offset, coeff):
    d = dist.reshape(-1, 1).astype(jnp.float32)
    return jnp.exp(coeff * (d - offset.reshape(1, -1)) ** 2)


if __name__ == "__main__":
    # Deterministic parameters (synthetic, matches __init__ signature).
    start, stop, num_gaussians, basis_width_scalar = 0.0, 5.0, 50, 1.0
    module = GaussianSmearing(start, stop, num_gaussians, basis_width_scalar)

    key = jax.random.PRNGKey(0)

    # Main small deterministic input: 128 pairwise distances (no pad, no slice).
    dist = jax.random.uniform(key, (128,), dtype=jnp.float32,
                              minval=0.0, maxval=5.0)
    out = jax.block_until_ready(module(dist))
    ref = _reference(dist, module.offset, module.coeff)
    assert out.shape == (128, num_gaussians), out.shape
    assert jnp.allclose(out, ref, atol=1e-5, rtol=1e-5), "mismatch vs reference"

    # Ragged case exercising the pad + trailing-slice path.
    dist2 = jax.random.uniform(jax.random.PRNGKey(1), (100,), dtype=jnp.float32,
                               minval=0.0, maxval=5.0)
    out2 = jax.block_until_ready(module(dist2))
    ref2 = _reference(dist2, module.offset, module.coeff)
    assert out2.shape == (100, num_gaussians), out2.shape
    assert jnp.allclose(out2, ref2, atol=1e-5, rtol=1e-5), "ragged mismatch"

    print("KERNEL_OK")
</pallas_src>

<mosaic_0001>
module attributes {stable_mosaic.version = 11 : i64} {
  func.func @_gaussian_smearing_kernel(%arg0: i32, %arg1: memref<128x1xf32, #tpu.memory_space<vmem>>, %arg2: memref<128x50xf32, #tpu.memory_space<vmem>>) attributes {dimension_semantics = [#tpu.dimension_semantics<parallel>], iteration_bounds = array<i64: 1>, scalar_prefetch = 0 : i64, scratch_operands = 0 : i64, tpu.core_type = #tpu.core_type<tc>, window_params = [{transform_indices = @transform_0, window_bounds = array<i64: 128, 1>}, {transform_indices = @transform_1, window_bounds = array<i64: 128, 50>}]} {
    %c0 = arith.constant 0 : index
    %c0_0 = arith.constant 0 : index
    %0 = vector.load %arg1[%c0, %c0_0] : memref<128x1xf32, #tpu.memory_space<vmem>>, vector<128x1xf32>
    %cst = arith.constant 6.92964649 : f32
    %1 = vector.broadcast %cst : f32 to vector<128x1xf32>
    %2 = arith.mulf %0, %1 : vector<128x1xf32>
    %3 = tpu.iota {dimensions = array<i32: 1>} : vector<1x50xi32>
    %4 = arith.sitofp %3 : vector<1x50xi32> to vector<1x50xf32>
    %cst_1 = arith.constant 0.707106769 : f32
    %5 = vector.broadcast %cst_1 : f32 to vector<1x50xf32>
    %6 = arith.mulf %5, %4 : vector<1x50xf32>
    %cst_2 = arith.constant 0.000000e+00 : f32
    %7 = vector.broadcast %cst_2 : f32 to vector<1x50xf32>
    %8 = arith.addf %7, %6 : vector<1x50xf32>
    %9 = vector.broadcast %2 : vector<128x1xf32> to vector<128x50xf32>
    %10 = vector.broadcast %8 : vector<1x50xf32> to vector<128x50xf32>
    %11 = arith.subf %9, %10 : vector<128x50xf32>
    %12 = arith.mulf %11, %11 : vector<128x50xf32>
    %cst_3 = arith.constant 0.000000e+00 : f32
    %13 = vector.broadcast %cst_3 : f32 to vector<128x50xf32>
    %14 = arith.subf %13, %12 : vector<128x50xf32>
    %15 = math.exp %14 : vector<128x50xf32>
    %c0_4 = arith.constant 0 : index
    %c0_5 = arith.constant 0 : index
    %16 = vector.load %arg2[%c0_4, %c0_5] : memref<128x50xf32, #tpu.memory_space<vmem>>, vector<128x50xf32>
    tpu.vector_store %arg2[%c0_4, %c0_5], %15 {strides = array<i32>} : memref<128x50xf32, #tpu.memory_space<vmem>>, vector<128x50xf32>,
    return
  }
  func.func @transform_0(%arg0: i32) -> (i32, i32) {
    %c0_i32 = arith.constant 0 : i32
    %c0_i32_0 = arith.constant 0 : i32
    return %arg0, %c0_i32 : i32, i32
  }
  func.func @transform_1(%arg0: i32) -> (i32, i32) {
    %c0_i32 = arith.constant 0 : i32
    %c0_i32_0 = arith.constant 0 : i32
    return %arg0, %c0_i32 : i32, i32
  }
}

</mosaic_0001>

<bundles_post_ra>
// kernel: tpu_custom_call.1
= control target key start
LH: loop header
LB: loop body
LE: loop exit
PB: predicated region body
PF: predicated region fallthrough
CT: control target
= control target key end

     0   :  { %v261_v0 = vmov 0   ;;  %v40_v33 = vlaneseq  ;;  %vm205_vm0 = vcmask 408576   ;;  %s402_s0 = inlined_call_operand.vmem [shape: f32[128,1], index: 0, kind: input, shape index: {}]   ;;  %s403_s1 = inlined_call_operand.vmem [shape: f32[128,50], index: 1, kind: output, shape index: {}]  }
   0x1   :  { %228 = vset.pattern.permute.xlu1 %v261_v0  ;;  %227 = vset.pattern.permute.xlu0 %v261_v0  ;;  %v10_v1 = vld [vmem:[%s402_s0 + $0x10] sm:$0xff]  ;;  %v8_v2 = vld [vmem:[%s402_s0] sm:$0xff]  ;;  %v11_v3 = vld [vmem:[%s402_s0 + $0x18] sm:$0xff] }
   0x2   :  { %v26_v4 = vmul.f32 6.9296465, %v10_v1  ;;  %v24_v5 = vmul.f32 6.9296465, %v8_v2  ;;  %v9_v6 = vld [vmem:[%s402_s0 + $0x8] sm:$0xff]  ;;  %v12_v10 = vld [vmem:[%s402_s0 + $0x20] sm:$0xff] }
   0x3   :  { %v27_v7 = vmul.f32 6.9296465, %v11_v3  ;;  %v25_v8 = vmul.f32 6.9296465, %v9_v6  ;;  %v13_v9 = vld [vmem:[%s402_s0 + $0x28] sm:$0xff]  ;;  %v15_v13 = vld [vmem:[%s402_s0 + $0x38] sm:$0xff] }
   0x4   :  { %57 = vperm.xlu1 %228, %v26_v4   ;;  %47 = vperm.xlu0 %227, %v24_v5   ;;  %v29_v11 = vmul.f32 6.9296465, %v13_v9  ;;  %v28_v12 = vmul.f32 6.9296465, %v12_v10  ;;  %v14_v14 = vld [vmem:[%s402_s0 + $0x30] sm:$0xff]  ;;  %v17_v17 = vld [vmem:[%s402_s0 + $0x48] sm:$0xff] }
   0x5   :  { %v31_v15 = vmul.f32 6.9296465, %v15_v13  ;;  %v30_v16 = vmul.f32 6.9296465, %v14_v14  ;;  %v16_v18 = vld [vmem:[%s402_s0 + $0x40] sm:$0xff]  ;;  %v19_v21 = vld [vmem:[%s402_s0 + $0x58] sm:$0xff] }
   0x6   :  { %v33_v19 = vmul.f32 6.9296465, %v17_v17  ;;  %v32_v20 = vmul.f32 6.9296465, %v16_v18  ;;  %v18_v22 = vld [vmem:[%s402_s0 + $0x50] sm:$0xff]  ;;  %v21_v25 = vld [vmem:[%s402_s0 + $0x68] sm:$0xff] }
   0x7   :  { %v35_v23 = vmul.f32 6.9296465, %v19_v21  ;;  %v34_v24 = vmul.f32 6.9296465, %v18_v22  ;;  %v20_v26 = vld [vmem:[%s402_s0 + $0x60] sm:$0xff]  ;;  %v23_v29 = vld [vmem:[%s402_s0 + $0x78] sm:$0xff] }
   0x8   :  { %62 = vperm.xlu1 %228, %v27_v7   ;;  %52 = vperm.xlu0 %227, %v25_v8   ;;  %v37_v27 = vmul.f32 6.9296465, %v21_v25  ;;  %v36_v28 = vmul.f32 6.9296465, %v20_v26  ;;  %v22_v30 = vld [vmem:[%s402_s0 + $0x70] sm:$0xff]  ;;  %v41_v34 = vand.u32 127, %v40_v33 }
   0x9   :  { %v39_v31 = vmul.f32 6.9296465, %v23_v29  ;;  %v38_v32 = vmul.f32 6.9296465, %v22_v30 }
   0xa   :  { %v42_v35 = vcvt.s32.f32 %v41_v34 }
   0xc   :  { %72 = vperm.xlu1 %228, %v29_v11   ;;  %67 = vperm.xlu0 %227, %v28_v12   ;;  %v320_v36 = vmul.f32 0.70710677, %v42_v35 }
  0x10   :  { %82 = vperm.xlu1 %228, %v31_v15   ;;  %77 = vperm.xlu0 %227, %v30_v16  }
  0x14   :  { %92 = vperm.xlu1 %228, %v33_v19   ;;  %87 = vperm.xlu0 %227, %v32_v20  }
  0x18   :  { %102 = vperm.xlu1 %228, %v35_v23   ;;  %97 = vperm.xlu0 %227, %v34_v24  }
  0x1c   :  { %112 = vperm.xlu1 %228, %v37_v27   ;;  %107 = vperm.xlu0 %227, %v36_v28  }
  0x20   :  { %122 = vperm.xlu1 %228, %v39_v31   ;;  %117 = vperm.xlu0 %227, %v38_v32  }
  0x83   :  { %v58_v37 = vpop.permute.xlu1 %57  ;;  %v48_v38 = vpop.permute.xlu0 %47 }
  0x84   :  { %v127_v39 = vsub.f32 %v58_v37, %v320_v36  ;;  %v125_v40 = vsub.f32 %v48_v38, %v320_v36 }
  0x86   :  { %v143_v41 = vmul.f32 %v127_v39, %v127_v39  ;;  %v141_v42 = vmul.f32 %v125_v40, %v125_v40 }
  0x87   :  { %v63_v43 = vpop.permute.xlu1 %62  ;;  %v53_v44 = vpop.permute.xlu0 %52 }
  0x88   :  { %v159_v45 = vsub.f32 0.0, %v143_v41  ;;  %v157_v46 = vsub.f32 0.0, %v141_v42  ;;  %v128_v47 = vsub.f32 %v63_v43, %v320_v36  ;;  %v126_v48 = vsub.f32 %v53_v44, %v320_v36 }
  0x8a   :  { %v177_v49 = vmul.f32 1.442695, %v159_v45  ;;  %v173_v50 = vmul.f32 1.442695, %v157_v46  ;;  %v144_v51 = vmul.f32 %v128_v47, %v128_v47  ;;  %v142_v52 = vmul.f32 %v126_v48, %v126_v48 }
  0x8b   :  { %v73_v53 = vpop.permute.xlu1 %72  ;;  %v68_v54 = vpop.permute.xlu0 %67 }
  0x8c   :  { %229 = vpow2.f32 %v177_v49  ;;  %v160_v55 = vsub.f32 0.0, %v144_v51  ;;  %v158_v56 = vsub.f32 0.0, %v142_v52  ;;  %v130_v57 = vsub.f32 %v73_v53, %v320_v36 }
  0x8d   :  { %231 = vpow2.f32 %v173_v50  ;;  %v129_v58 = vsub.f32 %v68_v54, %v320_v36 }
  0x8e   :  { %v179_v59 = vmul.f32 1.442695, %v160_v55  ;;  %v175_v60 = vmul.f32 1.442695, %v158_v56  ;;  %v146_v61 = vmul.f32 %v130_v57, %v130_v57 }
  0x8f   :  { %v145_v62 = vmul.f32 %v129_v58, %v129_v58  ;;  %v83_v63 = vpop.permute.xlu1 %82  ;;  %v78_v0 = vpop.permute.xlu0 %77 }
  0x90   :  { %233 = vpow2.f32 %v179_v59  ;;  %v162_v1 = vsub.f32 0.0, %v146_v61  ;;  %v132_v2 = vsub.f32 %v83_v63, %v320_v36  ;;  %v131_v3 = vsub.f32 %v78_v0, %v320_v36 }
  0x91   :  { %235 = vpow2.f32 %v175_v60  ;;  %v161_v4 = vsub.f32 0.0, %v145_v62 }
  0x92   :  { %v183_v5 = vmul.f32 1.442695, %v162_v1  ;;  %v148_v6 = vmul.f32 %v132_v2, %v132_v2  ;;  %v147_v7 = vmul.f32 %v131_v3, %v131_v3 }
  0x93   :  { %v181_v8 = vmul.f32 1.442695, %v161_v4  ;;  %v93_v9 = vpop.permute.xlu1 %92  ;;  %v88_v10 = vpop.permute.xlu0 %87 }
  0x94   :  { %237 = vpow2.f32 %v183_v5  ;;  %v164_v11 = vsub.f32 0.0, %v148_v6  ;;  %v163_v12 = vsub.f32 0.0, %v147_v7  ;;  %v134_v13 = vsub.f32 %v93_v9, %v320_v36 }
  0x95   :  { %239 = vpow2.f32 %v181_v8  ;;  %v133_v14 = vsub.f32 %v88_v10, %v320_v36 }
  0x96   :  { %v230_v15 = vpop.eup %229  ;;  %v187_v16 = vmul.f32 1.442695, %v164_v11  ;;  %v185_v17 = vmul.f32 1.442695, %v163_v12  ;;  %v150_v18 = vmul.f32 %v134_v13, %v134_v13 }
  0x97   :  { %v232_v19 = vpop.eup %231  ;;  %208 = vst.msk [vmem:[%s403_s1 + $0x10] sm:$0xff] %vm205_vm0, %v230_v15  ;;  %v149_v20 = vmul.f32 %v133_v14, %v133_v14  ;;  %v103_v21 = vpop.permute.xlu1 %102 }
  0x98   :  { %v98_v22 = vpop.permute.xlu0 %97  ;;  %206 = vst.msk [vmem:[%s403_s1] sm:$0xff] %vm205_vm0, %v232_v19  ;;  %241 = vpow2.f32 %v187_v16  ;;  %v166_v23 = vsub.f32 0.0, %v150_v18  ;;  %v136_v24 = vsub.f32 %v103_v21, %v320_v36 }
  0x99   :  { %v135_v25 = vsub.f32 %v98_v22, %v320_v36  ;;  %243 = vpow2.f32 %v185_v17  ;;  %v165_v26 = vsub.f32 0.0, %v149_v20 }
  0x9a   :  { %v234_v27 = vpop.eup %233  ;;  %v191_v28 = vmul.f32 1.442695, %v166_v23  ;;  %v152_v29 = vmul.f32 %v136_v24, %v136_v24 }
  0x9b   :  { %v151_v30 = vmul.f32 %v135_v25, %v135_v25  ;;  %v236_v31 = vpop.eup %235  ;;  %209 = vst.msk [vmem:[%s403_s1 + $0x18] sm:$0xff] %vm205_vm0, %v234_v27  ;;  %v189_v32 = vmul.f32 1.442695, %v165_v26  ;;  %v113_v33 = vpop.permute.xlu1 %112 }
  0x9c   :  { %v108_v34 = vpop.permute.xlu0 %107  ;;  %207 = vst.msk [vmem:[%s403_s1 + $0x8] sm:$0xff] %vm205_vm0, %v236_v31  ;;  %245 = vpow2.f32 %v191_v28  ;;  %v168_v35 = vsub.f32 0.0, %v152_v29  ;;  %v138_v38 = vsub.f32 %v113_v33, %v320_v36 }
  0x9d   :  { %v167_v37 = vsub.f32 0.0, %v151_v30  ;;  %247 = vpow2.f32 %v189_v32  ;;  %v137_v39 = vsub.f32 %v108_v34, %v320_v36 }
  0x9e   :  { %v238_v40 = vpop.eup %237  ;;  %v195_v41 = vmul.f32 1.442695, %v168_v35  ;;  %v154_v43 = vmul.f32 %v138_v38, %v138_v38 }
  0x9f   :  { %v193_v42 = vmul.f32 1.442695, %v167_v37  ;;  %v240_v44 = vpop.eup %239  ;;  %211 = vst.msk [vmem:[%s403_s1 + $0x28] sm:$0xff] %vm205_vm0, %v238_v40  ;;  %v153_v45 = vmul.f32 %v137_v39, %v137_v39  ;;  %v123_v46 = vpop.permute.xlu1 %122 }
  0xa0   :  { %v118_v47 = vpop.permute.xlu0 %117  ;;  %210 = vst.msk [vmem:[%s403_s1 + $0x20] sm:$0xff] %vm205_vm0, %v240_v44  ;;  %249 = vpow2.f32 %v195_v41  ;;  %v170_v48 = vsub.f32 0.0, %v154_v43  ;;  %v140_v49 = vsub.f32 %v123_v46, %v320_v36 }
  0xa1   :  { %v139_v50 = vsub.f32 %v118_v47, %v320_v36  ;;  %251 = vpow2.f32 %v193_v42  ;;  %v169_v51 = vsub.f32 0.0, %v153_v45 }
  0xa2   :  { %v242_v52 = vpop.eup %241  ;;  %v199_v53 = vmul.f32 1.442695, %v170_v48  ;;  %v156_v54 = vmul.f32 %v140_v49, %v140_v49 }
  0xa3   :  { %v155_v55 = vmul.f32 %v139_v50, %v139_v50  ;;  %v244_v56 = vpop.eup %243  ;;  %213 = vst.msk [vmem:[%s403_s1 + $0x38] sm:$0xff] %vm205_vm0, %v242_v52  ;;  %v197_v57 = vmul.f32 1.442695, %v169_v51 }
  0xa4   :  { %212 = vst.msk [vmem:[%s403_s1 + $0x30] sm:$0xff] %vm205_vm0, %v244_v56  ;;  %253 = vpow2.f32 %v199_v53  ;;  %v172_v36 = vsub.f32 0.0, %v156_v54 }
  0xa5   :  { %v171_v58 = vsub.f32 0.0, %v155_v55  ;;  %255 = vpow2.f32 %v197_v57 }
  0xa6   :  { %v246_v59 = vpop.eup %245  ;;  %v203_v60 = vmul.f32 1.442695, %v172_v36 }
  0xa7   :  { %v201_v61 = vmul.f32 1.442695, %v171_v58  ;;  %v248_v62 = vpop.eup %247  ;;  %215 = vst.msk [vmem:[%s403_s1 + $0x48] sm:$0xff] %vm205_vm0, %v246_v59 }
  0xa8   :  { %214 = vst.msk [vmem:[%s403_s1 + $0x40] sm:$0xff] %vm205_vm0, %v248_v62  ;;  %257 = vpow2.f32 %v203_v60 }
  0xa9   :  { %259 = vpow2.f32 %v201_v61 }
  0xaa   :  { %v250_v63 = vpop.eup %249 }
  0xab   :  { %v252_v0 = vpop.eup %251  ;;  %217 = vst.msk [vmem:[%s403_s1 + $0x58] sm:$0xff] %vm205_vm0, %v250_v63 }
  0xac   :  { %216 = vst.msk [vmem:[%s403_s1 + $0x50] sm:$0xff] %vm205_vm0, %v252_v0 }
  0xae   :  { %v254_v1 = vpop.eup %253 }
  0xaf   :  { %v256_v2 = vpop.eup %255  ;;  %219 = vst.msk [vmem:[%s403_s1 + $0x68] sm:$0xff] %vm205_vm0, %v254_v1 }
  0xb0   :  { %218 = vst.msk [vmem:[%s403_s1 + $0x60] sm:$0xff] %vm205_vm0, %v256_v2 }
  0xb2   :  { %v258_v3 = vpop.eup %257 }
  0xb3   :  { %v260_v4 = vpop.eup %259  ;;  %221 = vst.msk [vmem:[%s403_s1 + $0x78] sm:$0xff] %vm205_vm0, %v258_v3 }
  0xb4   :  { %220 = vst.msk [vmem:[%s403_s1 + $0x70] sm:$0xff] %vm205_vm0, %v260_v4 }

</bundles_post_ra>
